<compile_context>
chip_gen: v5e
topology: v5e:2x2
jax: 0.10.0
libtpu: 0.0.40
codegen_flags: <defaults>
</compile_context>

<pallas_src>
import jax
import jax.numpy as jnp
from jax.experimental import pallas as pl
from jax.experimental.pallas import tpu as pltpu


def _round_up(x, m):
    return (x + m - 1) // m * m


def prepare_dan_params(emb_table, V_w, V_b, W_w, W_b):
    """One-time parameter prep (padding to 128 multiples + bf16 casts), hoisted
    out of the per-call forward so repeated forwards don't re-pad weights."""
    vocab, E = emb_table.shape
    H = V_w.shape[1]
    O = W_w.shape[1]
    Vp = _round_up(vocab, 128)
    Ep = _round_up(E, 128)
    Hp = _round_up(H, 128)
    Op = _round_up(O, 128)

    emb_p = jnp.zeros((Vp, Ep), jnp.bfloat16).at[:vocab, :E].set(
        emb_table.astype(jnp.bfloat16))
    vw_p = jnp.zeros((Ep, Hp), jnp.bfloat16).at[:E, :H].set(V_w.astype(jnp.bfloat16))
    vb_p = jnp.zeros((1, Hp), jnp.float32).at[0, :H].set(V_b.astype(jnp.float32))
    ww_p = jnp.zeros((Hp, Op), jnp.bfloat16).at[:H, :O].set(W_w.astype(jnp.bfloat16))
    wb_p = jnp.zeros((1, Op), jnp.float32).at[0, :O].set(W_b.astype(jnp.float32))

    return {"emb": emb_p, "vw": vw_p, "vb": vb_p, "ww": ww_p, "wb": wb_p,
            "dims": (vocab, E, H, O)}


def dan_forward_prepared(params, word_idxs, *, max_tb=1024):
    """word_idxs: [B, L] int.  Returns [B, O] float32."""
    vocab, E, H, O = params["dims"]
    emb_p, vw_p, vb_p = params["emb"], params["vw"], params["vb"]
    ww_p, wb_p = params["ww"], params["wb"]
    Vp, Ep = emb_p.shape
    Hp = vw_p.shape[1]
    Op = ww_p.shape[1]

    B, L = word_idxs.shape

    # Batch tiling: big tiles amortize per-step overhead; for large batches cap
    # the tile so the grid has >= 2 steps (v7x megacore: both TensorCores busy).
    tb_full = _round_up(B, 8)
    TB = min(max_tb, tb_full)
    if tb_full >= 512:
        TB = min(TB, _round_up((tb_full + 1) // 2, 8))
    Bp = _round_up(B, TB)

    idx_p = jnp.zeros((Bp, L), jnp.int32).at[:B, :].set(word_idxs.astype(jnp.int32))

    inv_L = 1.0 / float(L)

    def kernel(idx_ref, emb_ref, vw_ref, vb_ref, ww_ref, wb_ref, out_ref):
        # idx_ref: [TB, L] i32   emb_ref: [Vp, Ep] bf16 (VMEM-resident)
        # vw_ref: [Ep, Hp] bf16  vb_ref: [1, Hp] f32
        # ww_ref: [Hp, Op] bf16  wb_ref: [1, Op] f32   out_ref: [TB, Op] f32
        idx = idx_ref[...]                                             # [TB, L]
        vocab_ids = jax.lax.broadcasted_iota(jnp.int32, (TB, Vp), 1)   # [TB, Vp]
        counts = jnp.zeros((TB, Vp), jnp.float32)
        # One-hot token counts (static unroll over L: one VPU compare+add each).
        for l in range(L):
            counts = counts + (idx[:, l:l + 1] == vocab_ids).astype(jnp.float32)
        # Fused embedding gather + mean as a one-hot matmul on the MXU.
        # (counts are small integers -> exact in bf16; 1/L applied in f32.)
        avg = jnp.dot(counts.astype(jnp.bfloat16), emb_ref[...],
                      preferred_element_type=jnp.float32) * inv_L      # [TB, Ep] f32
        # V linear + tanh (bf16 MXU inputs, f32 accumulate, f32 bias/EUP tanh).
        h = jnp.tanh(jnp.dot(avg.astype(jnp.bfloat16), vw_ref[...],
                             preferred_element_type=jnp.float32) + vb_ref[...])
        # W linear.
        out = jnp.dot(h.astype(jnp.bfloat16), ww_ref[...],
                      preferred_element_type=jnp.float32) + wb_ref[...]
        out_ref[...] = out.astype(out_ref.dtype)                       # lane-dense vst

    grid = (Bp // TB,)
    out_p = pl.pallas_call(
        kernel,
        out_shape=jax.ShapeDtypeStruct((Bp, Op), jnp.float32),
        grid=grid,
        in_specs=[
            # Token ids: the only batch-streamed input ([TB, L] int32 per step).
            pl.BlockSpec((TB, L), lambda i: (i, 0)),
            # Embedding table + weights/biases: constant index_map -> VMEM-resident.
            pl.BlockSpec((Vp, Ep), lambda i: (0, 0)),
            pl.BlockSpec((Ep, Hp), lambda i: (0, 0)),
            pl.BlockSpec((1, Hp), lambda i: (0, 0)),
            pl.BlockSpec((Hp, Op), lambda i: (0, 0)),
            pl.BlockSpec((1, Op), lambda i: (0, 0)),
        ],
        out_specs=pl.BlockSpec((TB, Op), lambda i: (i, 0)),
        compiler_params=pltpu.CompilerParams(
            dimension_semantics=("parallel",),      # batch tiles independent (v7x 2 TCs)
            vmem_limit_bytes=32 * 1024 * 1024,      # actual footprint is a few MiB
        ),
    )(idx_p, emb_p, vw_p, vb_p, ww_p, wb_p)

    # Padded rows/cols hold garbage-but-valid values; slice them off.
    # (Under jit this slice fuses into the consumer.)
    return out_p[:B, :O]


def dan_forward(emb_table, V_w, V_b, W_w, W_b, word_idxs, *, max_tb=1024):
    params = prepare_dan_params(emb_table, V_w, V_b, W_w, W_b)
    return dan_forward_prepared(params, word_idxs, max_tb=max_tb)


def reference_forward(emb_table, V_w, V_b, W_w, W_b, word_idxs):
    embeddings = jnp.take(emb_table, word_idxs, axis=0)
    avg = jnp.mean(embeddings, axis=1)
    h = jnp.tanh(avg @ V_w + V_b)
    return h @ W_w + W_b


if __name__ == "__main__":
    # Small shapes consistent with the module's forward.
    vocab, E, H, O = 20, 32, 32, 4
    B, L = 2, 8

    key = jax.random.PRNGKey(0)
    k_emb, k_vw, k_vb, k_ww, k_wb, k_idx = jax.random.split(key, 6)

    emb_table = jax.random.normal(k_emb, (vocab, E), dtype=jnp.float32)
    V_w = jax.random.normal(k_vw, (E, H), dtype=jnp.float32) * 0.1
    V_b = jax.random.normal(k_vb, (H,), dtype=jnp.float32) * 0.1
    W_w = jax.random.normal(k_ww, (H, O), dtype=jnp.float32) * 0.1
    W_b = jax.random.normal(k_wb, (O,), dtype=jnp.float32) * 0.1
    word_idxs = jax.random.randint(k_idx, (B, L), 0, vocab, dtype=jnp.int32)

    # One-time parameter prep (hoisted), then the fused forward kernel.
    params = prepare_dan_params(emb_table, V_w, V_b, W_w, W_b)
    out = dan_forward_prepared(params, word_idxs)
    out = jax.block_until_ready(out)

    ref = reference_forward(emb_table, V_w, V_b, W_w, W_b, word_idxs)
    assert out.shape == (B, O)
    # Tolerance accounts for bf16 table/MXU inputs (f32 accumulation) vs pure-f32 ref.
    assert jnp.allclose(out, ref, atol=1e-2, rtol=1e-2), "mismatch vs reference"

    print("KERNEL_OK")
</pallas_src>

<mosaic_0001>
module attributes {stable_mosaic.version = 11 : i64} {
  func.func @kernel(%arg0: i32, %arg1: memref<8x8xi32, #tpu.memory_space<vmem>>, %arg2: memref<128x128xbf16, #tpu.memory_space<vmem>>, %arg3: memref<128x128xbf16, #tpu.memory_space<vmem>>, %arg4: memref<1x128xf32, #tpu.memory_space<vmem>>, %arg5: memref<128x128xbf16, #tpu.memory_space<vmem>>, %arg6: memref<1x128xf32, #tpu.memory_space<vmem>>, %arg7: memref<8x128xf32, #tpu.memory_space<vmem>>) attributes {dimension_semantics = [#tpu.dimension_semantics<parallel>], iteration_bounds = array<i64: 1>, scalar_prefetch = 0 : i64, scratch_operands = 0 : i64, tpu.core_type = #tpu.core_type<tc>, window_params = [{transform_indices = @transform_0, window_bounds = array<i64: 8, 8>}, {pipeline_mode = #tpu.pipeline_mode<synchronous>, transform_indices = @transform_1, window_bounds = array<i64: 128, 128>}, {pipeline_mode = #tpu.pipeline_mode<synchronous>, transform_indices = @transform_2, window_bounds = array<i64: 128, 128>}, {pipeline_mode = #tpu.pipeline_mode<synchronous>, transform_indices = @transform_3, window_bounds = array<i64: 1, 128>}, {pipeline_mode = #tpu.pipeline_mode<synchronous>, transform_indices = @transform_4, window_bounds = array<i64: 128, 128>}, {pipeline_mode = #tpu.pipeline_mode<synchronous>, transform_indices = @transform_5, window_bounds = array<i64: 1, 128>}, {transform_indices = @transform_6, window_bounds = array<i64: 8, 128>}]} {
    %c0 = arith.constant 0 : index
    %c0_0 = arith.constant 0 : index
    %0 = vector.load %arg1[%c0, %c0_0] : memref<8x8xi32, #tpu.memory_space<vmem>>, vector<8x8xi32>
    %1 = tpu.iota {dimensions = array<i32: 1>} : vector<8x128xi32>
    %cst = arith.constant 0.000000e+00 : f32
    %2 = vector.broadcast %cst : f32 to vector<8x128xf32>
    %3 = vector.extract_strided_slice %0 {offsets = [0, 0], sizes = [8, 1], strides = [1, 1]} : vector<8x8xi32> to vector<8x1xi32>
    %4 = vector.broadcast %3 : vector<8x1xi32> to vector<8x128xi32>
    %5 = arith.cmpi eq, %4, %1 : vector<8x128xi32>
    %6 = arith.extui %5 : vector<8x128xi1> to vector<8x128xi32>
    %7 = arith.sitofp %6 : vector<8x128xi32> to vector<8x128xf32>
    %8 = arith.addf %2, %7 : vector<8x128xf32>
    %9 = vector.extract_strided_slice %0 {offsets = [0, 1], sizes = [8, 1], strides = [1, 1]} : vector<8x8xi32> to vector<8x1xi32>
    %10 = vector.broadcast %9 : vector<8x1xi32> to vector<8x128xi32>
    %11 = arith.cmpi eq, %10, %1 : vector<8x128xi32>
    %12 = arith.extui %11 : vector<8x128xi1> to vector<8x128xi32>
    %13 = arith.sitofp %12 : vector<8x128xi32> to vector<8x128xf32>
    %14 = arith.addf %8, %13 : vector<8x128xf32>
    %15 = vector.extract_strided_slice %0 {offsets = [0, 2], sizes = [8, 1], strides = [1, 1]} : vector<8x8xi32> to vector<8x1xi32>
    %16 = vector.broadcast %15 : vector<8x1xi32> to vector<8x128xi32>
    %17 = arith.cmpi eq, %16, %1 : vector<8x128xi32>
    %18 = arith.extui %17 : vector<8x128xi1> to vector<8x128xi32>
    %19 = arith.sitofp %18 : vector<8x128xi32> to vector<8x128xf32>
    %20 = arith.addf %14, %19 : vector<8x128xf32>
    %21 = vector.extract_strided_slice %0 {offsets = [0, 3], sizes = [8, 1], strides = [1, 1]} : vector<8x8xi32> to vector<8x1xi32>
    %22 = vector.broadcast %21 : vector<8x1xi32> to vector<8x128xi32>
    %23 = arith.cmpi eq, %22, %1 : vector<8x128xi32>
    %24 = arith.extui %23 : vector<8x128xi1> to vector<8x128xi32>
    %25 = arith.sitofp %24 : vector<8x128xi32> to vector<8x128xf32>
    %26 = arith.addf %20, %25 : vector<8x128xf32>
    %27 = vector.extract_strided_slice %0 {offsets = [0, 4], sizes = [8, 1], strides = [1, 1]} : vector<8x8xi32> to vector<8x1xi32>
    %28 = vector.broadcast %27 : vector<8x1xi32> to vector<8x128xi32>
    %29 = arith.cmpi eq, %28, %1 : vector<8x128xi32>
    %30 = arith.extui %29 : vector<8x128xi1> to vector<8x128xi32>
    %31 = arith.sitofp %30 : vector<8x128xi32> to vector<8x128xf32>
    %32 = arith.addf %26, %31 : vector<8x128xf32>
    %33 = vector.extract_strided_slice %0 {offsets = [0, 5], sizes = [8, 1], strides = [1, 1]} : vector<8x8xi32> to vector<8x1xi32>
    %34 = vector.broadcast %33 : vector<8x1xi32> to vector<8x128xi32>
    %35 = arith.cmpi eq, %34, %1 : vector<8x128xi32>
    %36 = arith.extui %35 : vector<8x128xi1> to vector<8x128xi32>
    %37 = arith.sitofp %36 : vector<8x128xi32> to vector<8x128xf32>
    %38 = arith.addf %32, %37 : vector<8x128xf32>
    %39 = vector.extract_strided_slice %0 {offsets = [0, 6], sizes = [8, 1], strides = [1, 1]} : vector<8x8xi32> to vector<8x1xi32>
    %40 = vector.broadcast %39 : vector<8x1xi32> to vector<8x128xi32>
    %41 = arith.cmpi eq, %40, %1 : vector<8x128xi32>
    %42 = arith.extui %41 : vector<8x128xi1> to vector<8x128xi32>
    %43 = arith.sitofp %42 : vector<8x128xi32> to vector<8x128xf32>
    %44 = arith.addf %38, %43 : vector<8x128xf32>
    %45 = vector.extract_strided_slice %0 {offsets = [0, 7], sizes = [8, 1], strides = [1, 1]} : vector<8x8xi32> to vector<8x1xi32>
    %46 = vector.broadcast %45 : vector<8x1xi32> to vector<8x128xi32>
    %47 = arith.cmpi eq, %46, %1 : vector<8x128xi32>
    %48 = arith.extui %47 : vector<8x128xi1> to vector<8x128xi32>
    %49 = arith.sitofp %48 : vector<8x128xi32> to vector<8x128xf32>
    %50 = arith.addf %44, %49 : vector<8x128xf32>
    %51 = arith.truncf %50 : vector<8x128xf32> to vector<8x128xbf16>
    %c0_1 = arith.constant 0 : index
    %c0_2 = arith.constant 0 : index
    %52 = vector.load %arg2[%c0_1, %c0_2] : memref<128x128xbf16, #tpu.memory_space<vmem>>, vector<128x128xbf16>
    %cst_3 = arith.constant dense<0.000000e+00> : vector<8x128xf32>
    %53 = tpu.matmul %51, %52, %cst_3 {dimension_numbers = #tpu.dot_dimension_numbers<[1], [0], [0], [1], [0, 0, 1, 1], [], []>} : vector<8x128xbf16>, vector<128x128xbf16>, vector<8x128xf32> -> vector<8x128xf32>
    %cst_4 = arith.constant 1.250000e-01 : f32
    %54 = vector.broadcast %cst_4 : f32 to vector<8x128xf32>
    %55 = arith.mulf %53, %54 : vector<8x128xf32>
    %56 = arith.truncf %55 : vector<8x128xf32> to vector<8x128xbf16>
    %c0_5 = arith.constant 0 : index
    %c0_6 = arith.constant 0 : index
    %57 = vector.load %arg3[%c0_5, %c0_6] : memref<128x128xbf16, #tpu.memory_space<vmem>>, vector<128x128xbf16>
    %cst_7 = arith.constant dense<0.000000e+00> : vector<8x128xf32>
    %58 = tpu.matmul %56, %57, %cst_7 {dimension_numbers = #tpu.dot_dimension_numbers<[1], [0], [0], [1], [0, 0, 1, 1], [], []>} : vector<8x128xbf16>, vector<128x128xbf16>, vector<8x128xf32> -> vector<8x128xf32>
    %c0_8 = arith.constant 0 : index
    %c0_9 = arith.constant 0 : index
    %59 = vector.load %arg4[%c0_8, %c0_9] : memref<1x128xf32, #tpu.memory_space<vmem>>, vector<1x128xf32>
    %60 = vector.broadcast %59 : vector<1x128xf32> to vector<8x128xf32>
    %61 = arith.addf %58, %60 : vector<8x128xf32>
    %62 = math.tanh %61 : vector<8x128xf32>
    %63 = arith.truncf %62 : vector<8x128xf32> to vector<8x128xbf16>
    %c0_10 = arith.constant 0 : index
    %c0_11 = arith.constant 0 : index
    %64 = vector.load %arg5[%c0_10, %c0_11] : memref<128x128xbf16, #tpu.memory_space<vmem>>, vector<128x128xbf16>
    %cst_12 = arith.constant dense<0.000000e+00> : vector<8x128xf32>
    %65 = tpu.matmul %63, %64, %cst_12 {dimension_numbers = #tpu.dot_dimension_numbers<[1], [0], [0], [1], [0, 0, 1, 1], [], []>} : vector<8x128xbf16>, vector<128x128xbf16>, vector<8x128xf32> -> vector<8x128xf32>
    %c0_13 = arith.constant 0 : index
    %c0_14 = arith.constant 0 : index
    %66 = vector.load %arg6[%c0_13, %c0_14] : memref<1x128xf32, #tpu.memory_space<vmem>>, vector<1x128xf32>
    %67 = vector.broadcast %66 : vector<1x128xf32> to vector<8x128xf32>
    %68 = arith.addf %65, %67 : vector<8x128xf32>
    %c0_15 = arith.constant 0 : index
    %c0_16 = arith.constant 0 : index
    %69 = vector.load %arg7[%c0_15, %c0_16] : memref<8x128xf32, #tpu.memory_space<vmem>>, vector<8x128xf32>
    tpu.vector_store %arg7[%c0_15, %c0_16], %68 {strides = array<i32>} : memref<8x128xf32, #tpu.memory_space<vmem>>, vector<8x128xf32>,
    return
  }
  func.func @transform_0(%arg0: i32) -> (i32, i32) {
    %c0_i32 = arith.constant 0 : i32
    %c0_i32_0 = arith.constant 0 : i32
    return %arg0, %c0_i32 : i32, i32
  }
  func.func @transform_1(%arg0: i32) -> (i32, i32) {
    %c0_i32 = arith.constant 0 : i32
    %c0_i32_0 = arith.constant 0 : i32
    %c0_i32_1 = arith.constant 0 : i32
    return %c0_i32, %c0_i32_0 : i32, i32
  }
  func.func @transform_2(%arg0: i32) -> (i32, i32) {
    %c0_i32 = arith.constant 0 : i32
    %c0_i32_0 = arith.constant 0 : i32
    %c0_i32_1 = arith.constant 0 : i32
    return %c0_i32, %c0_i32_0 : i32, i32
  }
  func.func @transform_3(%arg0: i32) -> (i32, i32) {
    %c0_i32 = arith.constant 0 : i32
    %c0_i32_0 = arith.constant 0 : i32
    %c0_i32_1 = arith.constant 0 : i32
    return %c0_i32, %c0_i32_0 : i32, i32
  }
  func.func @transform_4(%arg0: i32) -> (i32, i32) {
    %c0_i32 = arith.constant 0 : i32
    %c0_i32_0 = arith.constant 0 : i32
    %c0_i32_1 = arith.constant 0 : i32
    return %c0_i32, %c0_i32_0 : i32, i32
  }
  func.func @transform_5(%arg0: i32) -> (i32, i32) {
    %c0_i32 = arith.constant 0 : i32
    %c0_i32_0 = arith.constant 0 : i32
    %c0_i32_1 = arith.constant 0 : i32
    return %c0_i32, %c0_i32_0 : i32, i32
  }
  func.func @transform_6(%arg0: i32) -> (i32, i32) {
    %c0_i32 = arith.constant 0 : i32
    %c0_i32_0 = arith.constant 0 : i32
    return %arg0, %c0_i32 : i32, i32
  }
}

</mosaic_0001>

<bundles_post_ra>
// kernel: tpu_custom_call.1
= control target key start
LH: loop header
LB: loop body
LE: loop exit
PB: predicated region body
PF: predicated region fallthrough
CT: control target
= control target key end

     0   :  { %11 = vsyncpa [#allocation3], 0  ;;  %s765_s0 = inlined_call_operand.hbm [shape: s32[8,8], index: 0, kind: input, shape index: {}]   ;;  %s766_s1 = inlined_call_operand.hbm [shape: bf16[128,128], index: 1, kind: input, shape index: {}]   ;;  %s767_s2 = inlined_call_operand.hbm [shape: bf16[128,128], index: 2, kind: input, shape index: {}]   ;;  %s768_s3 = inlined_call_operand.vmem [shape: f32[1,128], index: 3, kind: input, shape index: {}]   ;;  %s769_s4 = inlined_call_operand.hbm [shape: bf16[128,128], index: 4, kind: input, shape index: {}]   ;;  %s770_s5 = inlined_call_operand.vmem [shape: f32[1,128], index: 5, kind: input, shape index: {}]   ;;  %s771_s6 = inlined_call_operand.hbm [shape: f32[8,128], index: 6, kind: output, shape index: {}]  }
   0x1   :  { %12 = vsyncpa [#allocation6], 0 }
   0x2   :  { %13 = vsyncpa [#allocation9], 0  ;;  %s30_s23 = sshll.u32 %s766_s1, 4  ;;  %s31_s23 = int_to_ptr.hbm [resolvable:$true] %s30_s23 }
   0x3   :  { %14 = vsyncpa [#allocation4], 0  ;;  %s693_s24 = smov [#allocation5]   ;;  %s20_s28 = sshll.u32 %s765_s0, 4  ;;  %s21_s28 = int_to_ptr.hbm [resolvable:$true] %s20_s28 }
   0x4   :  { %s32_s25 = sshll.u32 %s693_s24, 4  ;;  %s694_s29 = smov 64   ;;  %s33_s25 = int_to_ptr.vmem [resolvable:$true] %s32_s25 }
   0x5   :  { %s695_s30 = smov 4   ;;  %s696_s7 = smov [#allocation2]  }
   0x6   :  { %38 = dma.hbm_to_vmem [thread:$0]  %s31_s23, 1024, %s33_s25, [#allocation6], %s694_s29, %s694_s29, %s695_s30  }
   0x7   :  { %s22_s8 = sshll.u32 %s696_s7, 4  ;;  %s43_s11 = sshll.u32 %s767_s2, 4  ;;  %s23_s8 = int_to_ptr.vmem [resolvable:$true] %s22_s8  ;;  %s44_s11 = int_to_ptr.hbm [resolvable:$true] %s43_s11 }
   0x8   :  { %25 = dma.hbm_to_vmem [thread:$0]  %s21_s28, 128, %s23_s8, [#allocation3]  }
   0x9   :  { %s58_s13 = sshll.u32 %s769_s4, 4  ;;  %s697_s14 = smov [#allocation7]   ;;  %s59_s13 = int_to_ptr.hbm [resolvable:$true] %s58_s13 }
   0xa   :  { %s45_s15 = sshll.u32 %s697_s14, 4  ;;  %s698_s0 = smov [#allocation8]   ;;  %s46_s15 = int_to_ptr.vmem [resolvable:$true] %s45_s15 }
   0xb   :  { %51 = dma.hbm_to_vmem [thread:$0]  %s44_s11, 1024, %s46_s15, [#allocation6], %s694_s29, %s694_s29, %s695_s30  }
   0xc   :  { %s60_s16 = sshll.u32 %s698_s0, 4  ;;  %s61_s16 = int_to_ptr.vmem [resolvable:$true] %s60_s16 }
   0xd   :  { %66 = dma.hbm_to_vmem [thread:$0]  %s59_s13, 1024, %s61_s16, [#allocation9], %s694_s29, %s694_s29, %s695_s30  }
   0xe   :  { %685 = dma.done.wait [#allocation3], 128  }
   0xf   :  { %686 = vsyncadd [#allocation3], 4294967168 }
  0x10   :  { %687 = dma.done.wait [#allocation6], 2048  }
  0x11   :  { %688 = vsyncadd [#allocation6], 4294965248 }
  0x12   :  { %689 = dma.done.wait [#allocation9], 1024  }
  0x13   :  { %690 = vsyncadd [#allocation9], 4294966272  ;;  %v699_v0 = vmov 0   ;;  %v700_v1 = vmov 2   ;;  %v701_v2 = vmov 4   ;;  %v85_v3 = vld [vmem:[#allocation2] sm:$0xff]  ;;  %v86_v20 = vlaneseq }
  0x14   :  { %552 = vset.pattern.permute.xlu0 %v699_v0  ;;  %554 = vset.pattern.permute.xlu1 %v700_v1  ;;  %v519_v4 = vld [vmem:[#allocation5 + $0x38] sm:$0xff]  ;;  %v702_v5 = vmov 1   ;;  %v703_v6 = vmov 3   ;;  %v704_v7 = vmov 5   ;;  %v705_v8 = vmov 6   ;;  %v518_v10 = vld [vmem:[#allocation5 + $0x30] sm:$0xff] }
  0x15   :  { %556 = vset.pattern.permute.xlu2 %v701_v2  ;;  %89 = vperm.xlu0 %552, %v85_v3   ;;  %v706_v9 = vmov 7   ;;  %v517_v11 = vld [vmem:[#allocation5 + $0x28] sm:$0xff]  ;;  %v516_v12 = vld [vmem:[#allocation5 + $0x20] sm:$0xff]  ;;  %v515_v13 = vld [vmem:[#allocation5 + $0x18] sm:$0xff]  ;;  %v87_v24 = vand.u32 127, %v86_v20  ;;  %v707_v30 = vmov 0.0  }
  0x16   :  { %103 = vperm.xlu1 %554, %v85_v3   ;;  %117 = vperm.xlu2 %556, %v85_v3   ;;  %v514_v14 = vld [vmem:[#allocation5 + $0x10] sm:$0xff]  ;;  %v513_v15 = vld [vmem:[#allocation5 + $0x8] sm:$0xff]  ;;  %v512_v16 = vld [vmem:[#allocation5] sm:$0xff]  ;;  %s708_s19 = smov [#allocation10]   ;;  %s396_s23 = sshll.u32 %s771_s6, 4  ;;  %s397_s23 = int_to_ptr.hbm [resolvable:$true] %s396_s23 }
  0x17   :  { %209 = vmatpush.bf16.msra.mxu0 %v519_v4  ;;  %v527_v18 = vld [vmem:[#allocation7 + $0x38] sm:$0xff]  ;;  %v526_v19 = vld [vmem:[#allocation7 + $0x30] sm:$0xff]  ;;  %v525_v23 = vld [vmem:[#allocation7 + $0x28] sm:$0xff]  ;;  %s394_s20 = sshll.u32 %s708_s19, 4  ;;  %s395_s20 = int_to_ptr.vmem [resolvable:$true] %s394_s20 }
  0x18   :  { %292 = vmatpush.bf16.msra.mxu1 %v527_v18  ;;  %v524_v26 = vld [vmem:[#allocation7 + $0x20] sm:$0xff]  ;;  %v523_v29 = vld [vmem:[#allocation7 + $0x18] sm:$0xff]  ;;  %v522_v36 = vld [vmem:[#allocation7 + $0x10] sm:$0xff] }
  0x19   :  { %v521_v43 = vld [vmem:[#allocation7 + $0x8] sm:$0xff]  ;;  %v520_v51 = vld [vmem:[#allocation7] sm:$0xff]  ;;  %v535_v52 = vld [vmem:[#allocation8 + $0x38] sm:$0xff] }
  0x1a   :  { %375 = vmatpush.bf16.msra.mxu2 %v535_v52  ;;  %v534_v53 = vld [vmem:[#allocation8 + $0x30] sm:$0xff]  ;;  %v533_v54 = vld [vmem:[#allocation8 + $0x28] sm:$0xff]  ;;  %v532_v55 = vld [vmem:[#allocation8 + $0x20] sm:$0xff] }
  0x1b   :  { %210 = vmatpush.bf16.msra.mxu0 %v518_v10  ;;  %v531_v56 = vld [vmem:[#allocation8 + $0x18] sm:$0xff]  ;;  %v530_v61 = vld [vmem:[#allocation8 + $0x10] sm:$0xff]  ;;  %v529_v62 = vld [vmem:[#allocation8 + $0x8] sm:$0xff] }
  0x1c   :  { %293 = vmatpush.bf16.msra.mxu1 %v526_v19  ;;  %v528_v63 = vld [vmem:[#allocation8] sm:$0xff]  ;;  %v561_v0 = vld [vmem:[%s768_s3] ss:$0 sm:$0xff] }
  0x1d   :  { %553 = vset.pattern.permute.xlu0 %v702_v5 }
  0x1e   :  { %555 = vset.pattern.permute.xlu1 %v703_v6  ;;  %96 = vperm.xlu0 %553, %v85_v3   ;;  %v562_v6 = vld [vmem:[%s770_s5] ss:$0 sm:$0xff] }
  0x1f   :  { %110 = vperm.xlu1 %555, %v85_v3   ;;  %557 = vset.pattern.permute.xlu2 %v704_v7 }
  0x20   :  { %124 = vperm.xlu2 %557, %v85_v3   ;;  %211 = vmatpush.bf16.msra.mxu0 %v517_v11 }
  0x21   :  { %294 = vmatpush.bf16.msra.mxu1 %v525_v23  ;;  %376 = vmatpush.bf16.msra.mxu2 %v534_v53 }
  0x24   :  { %212 = vmatpush.bf16.msra.mxu0 %v516_v12 }
  0x25   :  { %295 = vmatpush.bf16.msra.mxu1 %v524_v26  ;;  %377 = vmatpush.bf16.msra.mxu2 %v533_v54 }
  0x26   :  { %560 = vset.pattern.permute.xlu0 %v706_v9 }
  0x27   :  { %558 = vset.pattern.permute.xlu1 %v705_v8 }
  0x28   :  { %131 = vperm.xlu1 %558, %v85_v3   ;;  %559 = vset.pattern.permute.xlu2 %v706_v9 }
  0x29   :  { %138 = vperm.xlu2 %559, %v85_v3   ;;  %213 = vmatpush.bf16.msra.mxu0 %v515_v13 }
  0x2a   :  { %296 = vmatpush.bf16.msra.mxu1 %v523_v29  ;;  %378 = vmatpush.bf16.msra.mxu2 %v532_v55 }
  0x2d   :  { %214 = vmatpush.bf16.msra.mxu0 %v514_v14 }
  0x2e   :  { %297 = vmatpush.bf16.msra.mxu1 %v522_v36  ;;  %379 = vmatpush.bf16.msra.mxu2 %v531_v56 }
  0x31   :  { %215 = vmatpush.bf16.msra.mxu0 %v513_v15 }
  0x32   :  { %298 = vmatpush.bf16.msra.mxu1 %v521_v43  ;;  %380 = vmatpush.bf16.msra.mxu2 %v530_v61 }
  0x35   :  { %216 = vmatpush.bf16.msra.mxu0 %v512_v16 }
  0x36   :  { %299 = vmatpush.bf16.msra.mxu1 %v520_v51  ;;  %381 = vmatpush.bf16.msra.mxu2 %v529_v62 }
  0x3a   :  { %382 = vmatpush.bf16.msra.mxu2 %v528_v63 }
  0x70   :  { %v118_v17 = vpop.permute.xlu2 %117 }
  0x71   :  { %vm119_vm4 = vcmp.eq.s32.totalorder %v118_v17, %v87_v24 }
  0x72   :  { %v412_v40 = vsel %vm119_vm4, 1.0, %v707_v30 }
  0x7a   :  { %v125_v25 = vpop.permute.xlu2 %124 }
  0x7b   :  { %vm126_vm5 = vcmp.eq.s32.totalorder %v125_v25, %v87_v24 }
  0x7c   :  { %v413_v44 = vsel %vm126_vm5, 1.0, %v707_v30 }
  0x83   :  { %v139_v38 = vpop.permute.xlu2 %138 }
  0x84   :  { %vm140_vm6 = vcmp.eq.s32.totalorder %v139_v38, %v87_v24 }
  0x85   :  { %v415_v47 = vsel %vm140_vm6, 1.0, %v707_v30 }
  0x87   :  { %v90_v21 = vpop.permute.xlu0 %89 }
  0x88   :  { %v104_v22 = vpop.permute.xlu1 %103  ;;  %vm91_vm0 = vcmp.eq.s32.totalorder %v90_v21, %v87_v24 }
  0x89   :  { %vm105_vm1 = vcmp.eq.s32.totalorder %v104_v22, %v87_v24  ;;  %v408_v31 = vsel %vm91_vm0, 1.0, %v707_v30 }
  0x8a   :  { %v410_v34 = vsel %vm105_vm1, 1.0, %v707_v30 }
  0x90   :  { %v97_v27 = vpop.permute.xlu0 %96 }
  0x91   :  { %v111_v28 = vpop.permute.xlu1 %110  ;;  %vm98_vm2 = vcmp.eq.s32.totalorder %v97_v27, %v87_v24 }
  0x92   :  { %v409_v32 = vsel %vm98_vm2, 1.0, %v707_v30  ;;  %vm112_vm3 = vcmp.eq.s32.totalorder %v111_v28, %v87_v24 }
  0x93   :  { %v101_v33 = vadd.f32 %v409_v32, %v408_v31  ;;  %v411_v37 = vsel %vm112_vm3, 1.0, %v707_v30 }
  0x95   :  { %v108_v35 = vadd.f32 %v410_v34, %v101_v33 }
  0x97   :  { %v115_v39 = vadd.f32 %v411_v37, %v108_v35 }
  0x99   :  { %v122_v41 = vadd.f32 %v412_v40, %v115_v39 }
  0x9a   :  { %v132_v42 = vpop.permute.xlu1 %131 }
  0x9b   :  { %vm133_vm7 = vcmp.eq.s32.totalorder %v132_v42, %v87_v24  ;;  %v129_v45 = vadd.f32 %v413_v44, %v122_v41 }
  0x9c   :  { %v414_v46 = vsel %vm133_vm7, 1.0, %v707_v30 }
  0x9d   :  { %v136_v48 = vadd.f32 %v414_v46, %v129_v45 }
  0x9f   :  { %v143_v49 = vadd.f32 %v415_v47, %v136_v48 }
  0xa1   :  { %v144_v50 = vpack.c.bf16 %v143_v49, %v143_v49 }
  0xa3   :  { %217 = vmatmul.bf16.vlgmr.msra.gmra.mxu0 %v144_v50 }
 0x120   :  { %v218_v57 = vpop.f32.mrf.mxu0 }
 0x121   :  { %v222_v58 = vmul.f32 0.125, %v218_v57 }
 0x123   :  { %v223_v59 = vpack.c.bf16 %v222_v58, %v222_v58 }
 0x125   :  { %300 = vmatmul.bf16.vlgmr.msra.gmra.mxu1 %v223_v59 }
 0x128   :  { %v220_v60 = vpop.f32.mrf.mxu0 }
 0x1a2   :  { %v301_v1 = vpop.f32.mrf.mxu1 }
 0x1a3   :  { %v302_v2 = vadd.f32 %v561_v0, %v301_v1 }
 0x1a5   :  { %563 = vtanh.f32 %v302_v2 }
 0x1aa   :  { %v303_v3 = vpop.f32.mrf.mxu1 }
 0x1ab   :  { %v564_v4 = vpop.eup %563 }
 0x1ac   :  { %v306_v5 = vpack.c.bf16 %v564_v4, %v564_v4 }
 0x1ae   :  { %383 = vmatmul.bf16.vlgmr.msra.gmra.mxu2 %v306_v5 }
 0x231   :  { %v384_v7 = vpop.f32.mrf.mxu2 }
 0x232   :  { %v385_v8 = vadd.f32 %v562_v6, %v384_v7 }
 0x234   :  { %388 = vst [vmem:[#allocation10] sm:$0xff] %v385_v8 }
 0x235   :  { %399 = dma.vmem_to_hbm [thread:$0]  %s395_s20, 128, %s397_s23, [#allocation4]  }
 0x239   :  { %v386_v9 = vpop.f32.mrf.mxu2 }
 0x23a   :  { %691 = dma.done.wait [#allocation4], 128  }
 0x23b   :  { %692 = vsyncadd [#allocation4], 4294967168 }
 0x23c   :  { %404 = vsyncpa [#allocation3], 1 }
 0x23d   :  { %405 = vsyncpa [#allocation6], 1 }
 0x23e   :  { %406 = vsyncpa [#allocation9], 1 }
 0x23f   :  { %407 = vsyncpa [#allocation4], 1 }

</bundles_post_ra>
